<compile_context>
chip_gen: v7x
topology: tpu7x:2x2x1
jax: 0.10.0
libtpu: 0.0.40
codegen_flags: <defaults>
</compile_context>

<pallas_src>
import functools

import jax
import jax.numpy as jnp
from jax import lax
from jax.experimental import pallas as pl
from jax.experimental.pallas import tpu as pltpu


def _miou_kernel(x_ref, t_ref, inter_ref, union_ref, *, hw, t_hw, n_classes):
    # x_ref:     (C, t_hw)    logits tile (native dtype) of one batch element
    # t_ref:     (1, t_hw)    int32 class-label tile
    # inter_ref: (C, acc_w)   f32 lane-dense intersection accumulator (resident over k)
    # union_ref: (C, acc_w)   f32 lane-dense union accumulator (resident over k)
    C = n_classes
    k = pl.program_id(1)

    @pl.when(k == 0)
    def _():
        inter_ref[...] = jnp.zeros_like(inter_ref)
        union_ref[...] = jnp.zeros_like(union_ref)

    # Column chunking: 128-lane chunks when the tile is lane-aligned; otherwise
    # (single full-extent tile, t_hw == HW <= 128 or unaligned) one chunk.
    if t_hw % 128 == 0:
        cw, num_chunks = 128, t_hw // 128
    else:
        cw, num_chunks = t_hw, 1

    ragged = (hw % t_hw) != 0                       # static: tail tile exists
    class_ids = lax.broadcasted_iota(jnp.int32, (C, cw), 0)   # hoisted
    if ragged:
        lane = lax.broadcasted_iota(jnp.int32, (1, cw), 1)    # hoisted
        rem = hw - k * t_hw                         # valid lanes in this tile

    def process(xc, tc, col):
        xc = xc.astype(jnp.float32)                 # (C, cw), f32 math
        if ragged:
            valid = lane < (rem - col)              # (1, cw)
            xc = jnp.where(valid, xc, 0.0)          # keep exp() finite on garbage
        # per-pixel softmax over the channel (sublane) axis
        m = jnp.max(xc, axis=0, keepdims=True)      # (1, cw)
        e = jnp.exp(xc - m)                         # (C, cw)  EUP
        denom = jnp.sum(e, axis=0, keepdims=True)   # (1, cw)
        probs = e * pl.reciprocal(denom, approx=False)
        match = tc == class_ids                     # (C, cw) fused one-hot
        inter_c = jnp.where(match, probs, 0.0)      # probs * one_hot
        union_c = jnp.where(match, 1.0, probs)      # probs + oh - probs*oh
        if ragged:
            inter_c = jnp.where(valid, inter_c, 0.0)
            union_c = jnp.where(valid, union_c, 0.0)
        return inter_c, union_c

    if num_chunks == 1:
        inter_acc, union_acc = process(x_ref[...], t_ref[...], 0)
    else:
        def chunk_body(j, carry):
            ia, ua = carry
            col = pl.multiple_of(j * cw, cw)        # cw == 128 here
            ic, uc = process(x_ref[:, pl.ds(col, cw)],
                             t_ref[:, pl.ds(col, cw)], col)
            return ia + ic, ua + uc

        zeros = jnp.zeros((C, cw), jnp.float32)
        inter_acc, union_acc = lax.fori_loop(
            0, num_chunks, chunk_body, (zeros, zeros),
            unroll=min(num_chunks, 8))

    # one lane-dense (C, acc_w) read-modify-write per grid step
    inter_ref[...] += inter_acc
    union_ref[...] += union_acc


def _round_down_128(n):
    return (n // 128) * 128


def miou_loss_pallas(inputs, target, n_classes, *, tile_hw=None,
                     tile_budget_bytes=None):
    """inputs: (N, C, H, W) float logits, target: (N, H, W) int labels."""
    N, C, H, W = inputs.shape
    assert C == n_classes
    HW = H * W

    x = inputs.reshape(N, C, HW)                   # native-dtype DMA (bf16 stays bf16)
    t = target.reshape(N, 1, HW)
    if t.dtype != jnp.int32:
        t = t.astype(jnp.int32)                    # no-op for int32 labels
    x_item = jnp.dtype(x.dtype).itemsize
    t_item = jnp.dtype(t.dtype).itemsize

    # Chip-aware budgets (v7x: 64 MiB VMEM -> ~4 MiB/buffer; v5e/v6e: 8 MiB).
    try:
        vmem_cap = int(pltpu.get_tpu_info().vmem_capacity_bytes)
    except Exception:  # fall back to the most conservative generation (v7x)
        vmem_cap = 64 << 20
    if tile_budget_bytes is None:
        tile_budget_bytes = int(min(max(vmem_cap // 16, 2 << 20), 8 << 20))

    budget_lanes = max(512, _round_down_128(tile_budget_bytes // max(1, C * x_item)))
    if tile_hw is not None:
        budget_lanes = max(128, _round_down_128(int(tile_hw)))

    # Spatial tile: lane-aligned (multiple of 128) unless it is the full extent.
    if HW <= 128 or (HW % 128 == 0 and HW <= budget_lanes):
        t_hw = HW
    else:
        t_hw = max(128, min(budget_lanes, _round_down_128(HW)))
    num_k = pl.cdiv(HW, t_hw)
    acc_w = 128 if t_hw % 128 == 0 else t_hw       # lane-dense accumulator width

    # Scoped-VMEM: double-buffered logits + labels tiles, two resident f32
    # output blocks, plus headroom; capped at 3/4 of physical VMEM.
    need = (2 * C * t_hw * x_item                  # logits tile, 2 buffers
            + 2 * t_hw * t_item                    # labels tile, 2 buffers
            + 2 * 2 * C * acc_w * 4                # inter/union output blocks
            + (2 << 20))                           # Mosaic internal scratch headroom
    vmem_limit = int(min(max(need, 16 << 20), (vmem_cap * 3) // 4))

    kernel = functools.partial(_miou_kernel, hw=HW, t_hw=t_hw, n_classes=C)
    inter, union = pl.pallas_call(
        kernel,
        out_shape=(
            jax.ShapeDtypeStruct((N, C, acc_w), jnp.float32),
            jax.ShapeDtypeStruct((N, C, acc_w), jnp.float32),
        ),
        grid=(N, num_k),                                          # reduction axis last
        in_specs=[
            pl.BlockSpec((None, C, t_hw), lambda b, k: (b, 0, k)),   # logits
            pl.BlockSpec((None, 1, t_hw), lambda b, k: (b, 0, k)),   # labels
        ],
        out_specs=[
            pl.BlockSpec((None, C, acc_w), lambda b, k: (b, 0, 0)),  # inter
            pl.BlockSpec((None, C, acc_w), lambda b, k: (b, 0, 0)),  # union
        ],
        compiler_params=pltpu.CompilerParams(
            dimension_semantics=("parallel", "arbitrary"),
            vmem_limit_bytes=vmem_limit),
    )(x, t)

    inter = jnp.sum(inter, axis=-1)                # (N, C): tiny final reduce
    union = jnp.sum(union, axis=-1)
    # final scalar glue (matches `1 - loss.mean()` in the PyTorch module)
    return 1.0 - jnp.mean(inter / union)


def _miou_loss_ref(inputs, target, n_classes):
    """Pure-JAX reference mirroring the PyTorch forward exactly."""
    N, C, H, W = inputs.shape
    probs = jax.nn.softmax(inputs.astype(jnp.float32), axis=1)
    one_hot = jax.nn.one_hot(target, n_classes, axis=1, dtype=jnp.float32)
    inter = (probs * one_hot).reshape(N, C, -1).sum(2)
    union = (probs + one_hot - probs * one_hot).reshape(N, C, -1).sum(2)
    return 1.0 - jnp.mean(inter / union)


if __name__ == "__main__":
    key = jax.random.PRNGKey(0)

    # Case 1: small shapes implied by the module (batch=2, classes=4, 16x16).
    n_classes = 4
    N, H, W = 2, 16, 16
    k1, k2, k3, k4 = jax.random.split(key, 4)
    inputs = jax.random.normal(k1, (N, n_classes, H, W), dtype=jnp.float32)
    target = jax.random.randint(k2, (N, H, W), 0, n_classes, dtype=jnp.int32)

    loss = jax.block_until_ready(miou_loss_pallas(inputs, target, n_classes))
    ref = jax.block_until_ready(_miou_loss_ref(inputs, target, n_classes))
    assert jnp.allclose(loss, ref, atol=1e-5, rtol=1e-5), (loss, ref)

    # Case 2: bf16 logits + ragged spatial extent (HW = 324).
    H2, W2 = 18, 18
    inputs2 = jax.random.normal(
        k3, (N, n_classes, H2, W2), dtype=jnp.float32).astype(jnp.bfloat16)
    target2 = jax.random.randint(k4, (N, H2, W2), 0, n_classes, dtype=jnp.int32)
    ref2 = jax.block_until_ready(_miou_loss_ref(inputs2, target2, n_classes))

    # 2a: default byte-budget tiling (t_hw = 256, 2 tiles, ragged tail, 2 chunks)
    loss2a = jax.block_until_ready(miou_loss_pallas(inputs2, target2, n_classes))
    assert jnp.allclose(loss2a, ref2, atol=1e-4, rtol=1e-4), (loss2a, ref2)

    # 2b: forced small tile (t_hw = 128, 3 tiles, single-chunk masked path)
    loss2b = jax.block_until_ready(
        miou_loss_pallas(inputs2, target2, n_classes, tile_hw=128))
    assert jnp.allclose(loss2b, ref2, atol=1e-4, rtol=1e-4), (loss2b, ref2)

    print("KERNEL_OK")
</pallas_src>

<mosaic_0001>
module attributes {stable_mosaic.version = 11 : i64} {
  func.func @_miou_kernel(%arg0: i32, %arg1: i32, %arg2: memref<1x4x256xf32, #tpu.memory_space<vmem>>, %arg3: memref<1x1x256xi32, #tpu.memory_space<vmem>>, %arg4: memref<1x4x128xf32, #tpu.memory_space<vmem>>, %arg5: memref<1x4x128xf32, #tpu.memory_space<vmem>>) attributes {dimension_semantics = [#tpu.dimension_semantics<parallel>, #tpu.dimension_semantics<arbitrary>], iteration_bounds = array<i64: 2, 1>, scalar_prefetch = 0 : i64, scratch_operands = 0 : i64, tpu.core_type = #tpu.core_type<tc>, window_params = [{transform_indices = @transform_0, window_bounds = array<i64: 1, 4, 256>}, {transform_indices = @transform_1, window_bounds = array<i64: 1, 1, 256>}, {transform_indices = @transform_2, window_bounds = array<i64: 1, 4, 128>}, {transform_indices = @transform_3, window_bounds = array<i64: 1, 4, 128>}]} {
    %c0_i32 = arith.constant 0 : i32
    %0 = arith.cmpi eq, %arg1, %c0_i32 : i32
    %1 = arith.extui %0 : i1 to i32
    %c0_i32_0 = arith.constant 0 : i32
    %2 = arith.cmpi ne, %1, %c0_i32_0 : i32
    scf.if %2 {
      %cst_30 = arith.constant 0.000000e+00 : f32
      %69 = vector.broadcast %cst_30 : f32 to vector<4x128xf32>
      %c0_31 = arith.constant 0 : index
      %c0_32 = arith.constant 0 : index
      %c0_33 = arith.constant 0 : index
      %70 = vector.load %arg4[%c0_31, %c0_32, %c0_33] : memref<1x4x128xf32, #tpu.memory_space<vmem>>, vector<1x4x128xf32>
      %71 = vector.shape_cast %70 : vector<1x4x128xf32> to vector<4x128xf32>
      %72 = vector.shape_cast %69 : vector<4x128xf32> to vector<1x4x128xf32>
      tpu.vector_store %arg4[%c0_31, %c0_32, %c0_33], %72 {strides = array<i32>} : memref<1x4x128xf32, #tpu.memory_space<vmem>>, vector<1x4x128xf32>,
      %cst_34 = arith.constant 0.000000e+00 : f32
      %73 = vector.broadcast %cst_34 : f32 to vector<4x128xf32>
      %c0_35 = arith.constant 0 : index
      %c0_36 = arith.constant 0 : index
      %c0_37 = arith.constant 0 : index
      %74 = vector.load %arg5[%c0_35, %c0_36, %c0_37] : memref<1x4x128xf32, #tpu.memory_space<vmem>>, vector<1x4x128xf32>
      %75 = vector.shape_cast %74 : vector<1x4x128xf32> to vector<4x128xf32>
      %76 = vector.shape_cast %73 : vector<4x128xf32> to vector<1x4x128xf32>
      tpu.vector_store %arg5[%c0_35, %c0_36, %c0_37], %76 {strides = array<i32>} : memref<1x4x128xf32, #tpu.memory_space<vmem>>, vector<1x4x128xf32>,
    } else {
    }
    %3 = tpu.iota {dimensions = array<i32: 0>} : vector<4x128xi32>
    %cst = arith.constant 0.000000e+00 : f32
    %4 = vector.broadcast %cst : f32 to vector<4x128xf32>
    %c0_i32_1 = arith.constant 0 : i32
    %c128_i32 = arith.constant 128 : i32
    %5 = arith.muli %c0_i32_1, %c128_i32 : i32
    %6 = tpu.assume_multiple %5, 128 : i32
    %c0 = arith.constant 0 : index
    %c0_2 = arith.constant 0 : index
    %7 = arith.index_cast %6 : i32 to index
    %8 = vector.load %arg2[%c0, %c0_2, %7] : memref<1x4x256xf32, #tpu.memory_space<vmem>>, vector<1x4x128xf32>
    %9 = vector.shape_cast %8 : vector<1x4x128xf32> to vector<4x128xf32>
    %c0_3 = arith.constant 0 : index
    %c0_4 = arith.constant 0 : index
    %10 = arith.index_cast %6 : i32 to index
    %11 = vector.load %arg3[%c0_3, %c0_4, %10] : memref<1x1x256xi32, #tpu.memory_space<vmem>>, vector<1x1x128xi32>
    %12 = vector.shape_cast %11 : vector<1x1x128xi32> to vector<1x128xi32>
    %cst_5 = arith.constant dense<0xFF800000> : vector<128xf32>
    %13 = vector.multi_reduction <maximumf>, %9, %cst_5 [0] : vector<4x128xf32> to vector<128xf32>
    %14 = vector.shape_cast %13 : vector<128xf32> to vector<1x128xf32>
    %15 = vector.broadcast %14 : vector<1x128xf32> to vector<4x128xf32>
    %16 = arith.subf %9, %15 : vector<4x128xf32>
    %17 = math.exp %16 : vector<4x128xf32>
    %cst_6 = arith.constant dense<0.000000e+00> : vector<128xf32>
    %18 = vector.multi_reduction <add>, %17, %cst_6 [0] : vector<4x128xf32> to vector<128xf32>
    %19 = vector.shape_cast %18 : vector<128xf32> to vector<1x128xf32>
    %20 = tpu.reciprocal %19 : vector<1x128xf32> -> vector<1x128xf32>
    %21 = vector.broadcast %20 : vector<1x128xf32> to vector<4x128xf32>
    %22 = arith.mulf %17, %21 : vector<4x128xf32>
    %23 = vector.broadcast %12 : vector<1x128xi32> to vector<4x128xi32>
    %24 = arith.cmpi eq, %23, %3 : vector<4x128xi32>
    %cst_7 = arith.constant 0.000000e+00 : f32
    %25 = vector.broadcast %cst_7 : f32 to vector<4x128xf32>
    %26 = arith.select %24, %22, %25 : vector<4x128xi1>, vector<4x128xf32>
    %cst_8 = arith.constant 1.000000e+00 : f32
    %27 = vector.broadcast %cst_8 : f32 to vector<4x128xf32>
    %28 = arith.select %24, %27, %22 : vector<4x128xi1>, vector<4x128xf32>
    %29 = arith.addf %4, %26 : vector<4x128xf32>
    %30 = arith.addf %4, %28 : vector<4x128xf32>
    %c1_i32 = arith.constant 1 : i32
    %c128_i32_9 = arith.constant 128 : i32
    %31 = arith.muli %c1_i32, %c128_i32_9 : i32
    %32 = tpu.assume_multiple %31, 128 : i32
    %c0_10 = arith.constant 0 : index
    %c0_11 = arith.constant 0 : index
    %33 = arith.index_cast %32 : i32 to index
    %34 = vector.load %arg2[%c0_10, %c0_11, %33] : memref<1x4x256xf32, #tpu.memory_space<vmem>>, vector<1x4x128xf32>
    %35 = vector.shape_cast %34 : vector<1x4x128xf32> to vector<4x128xf32>
    %c0_12 = arith.constant 0 : index
    %c0_13 = arith.constant 0 : index
    %36 = arith.index_cast %32 : i32 to index
    %37 = vector.load %arg3[%c0_12, %c0_13, %36] : memref<1x1x256xi32, #tpu.memory_space<vmem>>, vector<1x1x128xi32>
    %38 = vector.shape_cast %37 : vector<1x1x128xi32> to vector<1x128xi32>
    %cst_14 = arith.constant dense<0xFF800000> : vector<128xf32>
    %39 = vector.multi_reduction <maximumf>, %35, %cst_14 [0] : vector<4x128xf32> to vector<128xf32>
    %40 = vector.shape_cast %39 : vector<128xf32> to vector<1x128xf32>
    %41 = vector.broadcast %40 : vector<1x128xf32> to vector<4x128xf32>
    %42 = arith.subf %35, %41 : vector<4x128xf32>
    %43 = math.exp %42 : vector<4x128xf32>
    %cst_15 = arith.constant dense<0.000000e+00> : vector<128xf32>
    %44 = vector.multi_reduction <add>, %43, %cst_15 [0] : vector<4x128xf32> to vector<128xf32>
    %45 = vector.shape_cast %44 : vector<128xf32> to vector<1x128xf32>
    %46 = tpu.reciprocal %45 : vector<1x128xf32> -> vector<1x128xf32>
    %47 = vector.broadcast %46 : vector<1x128xf32> to vector<4x128xf32>
    %48 = arith.mulf %43, %47 : vector<4x128xf32>
    %49 = vector.broadcast %38 : vector<1x128xi32> to vector<4x128xi32>
    %50 = arith.cmpi eq, %49, %3 : vector<4x128xi32>
    %cst_16 = arith.constant 0.000000e+00 : f32
    %51 = vector.broadcast %cst_16 : f32 to vector<4x128xf32>
    %52 = arith.select %50, %48, %51 : vector<4x128xi1>, vector<4x128xf32>
    %cst_17 = arith.constant 1.000000e+00 : f32
    %53 = vector.broadcast %cst_17 : f32 to vector<4x128xf32>
    %54 = arith.select %50, %53, %48 : vector<4x128xi1>, vector<4x128xf32>
    %55 = arith.addf %29, %52 : vector<4x128xf32>
    %56 = arith.addf %30, %54 : vector<4x128xf32>
    %c2_i32 = arith.constant 2 : i32
    %c0_18 = arith.constant 0 : index
    %c0_19 = arith.constant 0 : index
    %c0_20 = arith.constant 0 : index
    %57 = vector.load %arg4[%c0_18, %c0_19, %c0_20] : memref<1x4x128xf32, #tpu.memory_space<vmem>>, vector<1x4x128xf32>
    %58 = vector.shape_cast %57 : vector<1x4x128xf32> to vector<4x128xf32>
    %59 = arith.addf %58, %55 : vector<4x128xf32>
    %c0_21 = arith.constant 0 : index
    %c0_22 = arith.constant 0 : index
    %c0_23 = arith.constant 0 : index
    %60 = vector.load %arg4[%c0_21, %c0_22, %c0_23] : memref<1x4x128xf32, #tpu.memory_space<vmem>>, vector<1x4x128xf32>
    %61 = vector.shape_cast %60 : vector<1x4x128xf32> to vector<4x128xf32>
    %62 = vector.shape_cast %59 : vector<4x128xf32> to vector<1x4x128xf32>
    tpu.vector_store %arg4[%c0_21, %c0_22, %c0_23], %62 {strides = array<i32>} : memref<1x4x128xf32, #tpu.memory_space<vmem>>, vector<1x4x128xf32>,
    %c0_24 = arith.constant 0 : index
    %c0_25 = arith.constant 0 : index
    %c0_26 = arith.constant 0 : index
    %63 = vector.load %arg5[%c0_24, %c0_25, %c0_26] : memref<1x4x128xf32, #tpu.memory_space<vmem>>, vector<1x4x128xf32>
    %64 = vector.shape_cast %63 : vector<1x4x128xf32> to vector<4x128xf32>
    %65 = arith.addf %64, %56 : vector<4x128xf32>
    %c0_27 = arith.constant 0 : index
    %c0_28 = arith.constant 0 : index
    %c0_29 = arith.constant 0 : index
    %66 = vector.load %arg5[%c0_27, %c0_28, %c0_29] : memref<1x4x128xf32, #tpu.memory_space<vmem>>, vector<1x4x128xf32>
    %67 = vector.shape_cast %66 : vector<1x4x128xf32> to vector<4x128xf32>
    %68 = vector.shape_cast %65 : vector<4x128xf32> to vector<1x4x128xf32>
    tpu.vector_store %arg5[%c0_27, %c0_28, %c0_29], %68 {strides = array<i32>} : memref<1x4x128xf32, #tpu.memory_space<vmem>>, vector<1x4x128xf32>,
    return
  }
  func.func @transform_0(%arg0: i32, %arg1: i32) -> (i32, i32, i32) {
    %c0_i32 = arith.constant 0 : i32
    %c0_i32_0 = arith.constant 0 : i32
    return %arg0, %c0_i32, %arg1 : i32, i32, i32
  }
  func.func @transform_1(%arg0: i32, %arg1: i32) -> (i32, i32, i32) {
    %c0_i32 = arith.constant 0 : i32
    %c0_i32_0 = arith.constant 0 : i32
    return %arg0, %c0_i32, %arg1 : i32, i32, i32
  }
  func.func @transform_2(%arg0: i32, %arg1: i32) -> (i32, i32, i32) {
    %c0_i32 = arith.constant 0 : i32
    %c0_i32_0 = arith.constant 0 : i32
    %c0_i32_1 = arith.constant 0 : i32
    return %arg0, %c0_i32, %c0_i32_0 : i32, i32, i32
  }
  func.func @transform_3(%arg0: i32, %arg1: i32) -> (i32, i32, i32) {
    %c0_i32 = arith.constant 0 : i32
    %c0_i32_0 = arith.constant 0 : i32
    %c0_i32_1 = arith.constant 0 : i32
    return %arg0, %c0_i32, %c0_i32_0 : i32, i32, i32
  }
}

</mosaic_0001>

<bundles_post_ra>
// kernel: tpu_custom_call.1
= control target key start
LH: loop header
LB: loop body
LE: loop exit
PB: predicated region body
PF: predicated region fallthrough
CT: control target
= control target key end

     0   :  { %9 = vsyncpa [#allocation3], 0  ;;  %s1084_s0 = inlined_call_operand.hbm [shape: f32[2,4,256], index: 0, kind: input, shape index: {}]   ;;  %s1085_s1 = inlined_call_operand.hbm [shape: s32[2,1,256], index: 1, kind: input, shape index: {}]   ;;  %s1086_s2 = inlined_call_operand.hbm [shape: f32[2,4,128], index: 2, kind: output, shape index: {0}]   ;;  %s1087_s3 = inlined_call_operand.hbm [shape: f32[2,4,128], index: 3, kind: output, shape index: {1}]  }
   0x1   :  { %11 = vsyncpa [#allocation3 + $0x1], 0 }
   0x2   :  { %12 = vsyncpa [#allocation6], 0 }
   0x3   :  { %14 = vsyncpa [#allocation6 + $0x1], 0 }
   0x4   :  { %15 = vsyncpa [#allocation4], 0 }
   0x5   :  { %17 = vsyncpa [#allocation4 + $0x1], 0 }
   0x6   :  { %18 = vsyncpa [#allocation9], 0 }
   0x7   :  { %20 = vsyncpa [#allocation9 + $0x1], 0  ;;  %s819_s12 = smov 0   ;;  %s821_s13 = smov 0  }
   0x8   :  { %s823_s14 = smov 0   ;;  %s825_s15 = smov 0  }
   0x9   :  { %s827_s16 = smov 0   ;;  %s829_s17 = smov 0  }
   0xa LB: > { %s506_s18 = sadd.s32 4294967295, %s792_s17   ;;  %s507_s19 = sadd.s32 4294967294, %s792_s17   ;;  %s792_s17 = sphi %s829_s17, %s26_s17   ;;  %s788_s16 = sphi %s827_s16, %s1107_s16   ;;  %s784_s15 = sphi %s825_s15, %s1106_s15   ;;  %s780_s14 = sphi %s823_s14, %s1105_s14   ;;  %s776_s13 = sphi %s821_s13, %s1104_s13   ;;  %s772_s12 = sphi %s819_s12, %s1103_s12  }
   0xb   : > { %s38_s20 = sadd.s32 1, %s788_s16  ;;  %s47_s21 = sadd.s32 1, %s780_s14 }
   0xc   : > { %p40_p0 = scmp.ge.s32.totalorder %s38_s20, 2  ;;  %p54_p1 = scmp.ne.s32.totalorder %s780_s14, %s776_s13 }
   0xd   : > { %p55_p2 = scmp.eq.s32.totalorder %s792_s17, 0  ;;  %p60_p3 = scmp.ne.s32.totalorder %s776_s13, %s772_s12 }
   0xe   : > { %s1109_s20 = smov (%p40_p0, %s38_s20), 0  ;;  %p61_p5 = scmp.eq.s32.totalorder %s506_s18, 0 }
   0xf   : > { %p860_p4 = por %p55_p2, %p54_p1  ;;  %s42_s23 = ssub.s32 %s788_s16, %s1109_s20 }
  0x10   : > { %p112_p6 = scmp.eq.s32.totalorder %s506_s18, 1  ;;  %p45_p7 = scmp.eq.s32.totalorder %s42_s23, 0 }
  0x11   : > { %p866_p8 = por %p61_p5, %p60_p3  ;;  %p118_p10 = scmp.eq.s32.totalorder %s507_s19, 1 }
  0x12   : > { %p870_p9 = por %p112_p6, %p54_p1  ;;  %p555_p13 = scmp.lt.s32.totalorder %s792_s17, 2 }
  0x13   : > { %s1091_s24 = scalar_select %p866_p8, 1, 0 }
  0x14   : > { %s1092_s25 = scalar_select %p870_p9, 1, 0 }
  0x15   : > { %s875_s26 = scalar_select %p45_p7, %s780_s14, %s47_s21  }
  0x16   : > { %p877_p11 = por %p118_p10, %p60_p3  ;;  %s884_s28 = sand.u32 1, %s780_s14  }
  0x17   : > { %s510_s29 = sshll.u32 %s884_s28, 3  ;;  %s531_s30 = sshll.u32 %s788_s16, 7 }
  0x18   : > { %s1093_s27 = scalar_select %p877_p11, 1, 0 }
  0x19   : > { %s891_s6 = scalar_lea.hbm %s1084_s0, %s531_s30  ;;  %s168_s7 = scalar_lea.vmem [#allocation2], %s510_s29 }
  0x1a   : > { %s178_s8 = sshll.u32 %s168_s7, 4  ;;  %p897_p0 = pnand %p555_p13, %p860_p4  ;;  %s893_s8 = int_to_ptr.vmem [resolvable:$true] %s178_s8 }
  0x1b   : > { %s165_s10 = scalar_lea.sflag [#allocation3], %s884_s28  ;;  %s614_s11 = scalar_lea.hbm %s891_s6, 128 }
  0x1c   : > { %p615_p3 = scmp.ne.s32.totalorder %s891_s6, %s614_s11  ;;  %p616_p5 = pneg %p897_p0 }
  0x1d   : > { %s619_s21 = scalar_lea.hbm %s1084_s0, 256  ;;  %p620_p4 = scmp.lt.u32.totalorder %s891_s6, %s1084_s0 }
  0x1e   : > { %p617_p6 = pnand %p616_p5, %p615_p3  ;;  %p621_p10 = scmp.lt.u32.totalorder %s619_s21, %s614_s11 }
  0x1f   : > { %p623_p12 = scmp.lt.u32.totalorder %s614_s11, %s891_s6 }
  0x20   : > { %p618_p7 = pneg %p617_p6  ;;  %p622_p13 = por %p621_p10, %p620_p4 }
  0x22   : > { %p624_p1 = por %p623_p12, %p622_p13 }
  0x24   : > { %p625_p2 = pnand %p624_p1, %p618_p7 }
  0x26   : > { %628 = shalt.err (!%p625_p2)
}
  0x27   : > { %s629_s29 = scalar_lea.vmem %s893_s8, 128  ;;  %s794_s30 = smov [#allocation2]  }
  0x28   : > { %p630_p3 = scmp.ne.s32.totalorder %s893_s8, %s629_s29  ;;  %s634_s4 = sshll.u32 %s794_s30, 4  ;;  %s635_s4 = int_to_ptr.vmem [resolvable:$false] %s634_s4 }
  0x29   : > { %s636_s5 = scalar_lea.vmem %s635_s4, 256  ;;  %p637_p9 = scmp.lt.s32.totalorder %s893_s8, %s635_s4 }
  0x2a   : > { %p632_p6 = pnand %p630_p3, %p616_p5  ;;  %p638_p4 = scmp.lt.s32.totalorder %s636_s5, %s629_s29 }
  0x2c   : > { %p633_p11 = pneg %p632_p6  ;;  %p639_p10 = por %p638_p4, %p637_p9 }
  0x2e   : > { %p640_p12 = pnand %p639_p10, %p633_p11 }
  0x30   : > { %643 = shalt.err (!%p640_p12)
}
  0x31   : > { %544 = dma.hbm_to_vmem [thread:$0]  (!%p897_p0), %s891_s6, 128, %s893_s8, %s165_s10  }
  0x32   : > { %p1095_p1 = scmp.lt.s32.totalorder %s792_s17, 3  ;;  %p1096_p2 = scmp.ge.s32.totalorder %s792_s17, 1 }
  0x33   : > { %s513_s11 = sshll.u32 %s884_s28, 1  ;;  %s532_s18 = sshll.u32 %s788_s16, 5 }
  0x34   : > { %p933_p7 = pnand %p1096_p2, %p1095_p1  ;;  %s942_s22 = scalar_lea.hbm %s1085_s1, %s532_s18 }
  0x35   : > { %s189_s23 = scalar_lea.vmem [#allocation5], %s513_s11  ;;  %s186_s6 = scalar_lea.sflag [#allocation6], %s884_s28 }
  0x36   : > { %s1097_s7 = scalar_select %p933_p7, 1, 0 }
  0x37   : > { %s199_s29 = sshll.u32 %s189_s23, 4  ;;  %s644_s8 = scalar_lea.hbm %s942_s22, 32  ;;  %s200_s29 = int_to_ptr.vmem [resolvable:$true] %s199_s29 }
  0x38   : > { %p645_p9 = scmp.ne.s32.totalorder %s942_s22, %s644_s8  ;;  %s649_s4 = scalar_lea.hbm %s1085_s1, 64 }
  0x39   : > { %p650_p3 = scmp.lt.u32.totalorder %s942_s22, %s1085_s1  ;;  %p651_p6 = scmp.lt.u32.totalorder %s649_s4, %s644_s8 }
  0x3a   : > { %p647_p11 = pnand %p645_p9, %p616_p5  ;;  %p653_p10 = scmp.lt.u32.totalorder %s644_s8, %s942_s22 }
  0x3b   : > { %p652_p4 = por %p651_p6, %p650_p3 }
  0x3c   : > { %p648_p13 = pneg %p647_p11 }
  0x3d   : > { %p654_p12 = por %p653_p10, %p652_p4 }
  0x3f   : > { %p655_p1 = pnand %p654_p12, %p648_p13 }
  0x41   : > { %658 = shalt.err (!%p655_p1)
}
  0x42   : > { %s659_s28 = scalar_lea.vmem %s200_s29, 32  ;;  %s795_s11 = smov [#allocation5]  }
  0x43   : > { %p660_p2 = scmp.ne.s32.totalorder %s200_s29, %s659_s28  ;;  %s664_s19 = sshll.u32 %s795_s11, 4  ;;  %s665_s19 = int_to_ptr.vmem [resolvable:$false] %s664_s19 }
  0x44   : > { %s666_s21 = scalar_lea.vmem %s665_s19, 64  ;;  %p667_p8 = scmp.lt.s32.totalorder %s200_s29, %s665_s19 }
  0x45   : > { %p662_p9 = pnand %p660_p2, %p616_p5  ;;  %p668_p7 = scmp.lt.s32.totalorder %s666_s21, %s659_s28 }
  0x47   : > { %p663_p11 = pneg %p662_p9  ;;  %p669_p3 = por %p668_p7, %p667_p8 }
  0x49   : > { %p670_p6 = pnand %p669_p3, %p663_p11 }
  0x4b   : > { %673 = shalt.err (!%p670_p6)
}
  0x4c   : > { %547 = dma.hbm_to_vmem [thread:$0]  (!%p897_p0), %s942_s22, 32, %s200_s29, %s186_s6  }
  0x4d   : > { %p1098_p13 = scmp.ne.s32.totalorder %s1097_s7, 0 }
  0x4e   : > { %s967_s23 = sand.u32 (!%p1098_p13), 1, %s776_s13   ;;  %p1099_p5 = scmp.ne.s32.totalorder (!%p1098_p13), %s1091_s24, 0 }
  0x4f   : > { %208 = sbr.rel (%p1098_p13) target bundleno = 188 (0xbc), region = 28  ;;  %s517_s8 = sshll.u32 (!%p1098_p13), %s967_s23, 3 }
  0x50   : > { %s211_s10 = scalar_lea.sflag (!%p1098_p13), [#allocation3], %s967_s23  ;;  %s214_s30 = scalar_lea.vmem (!%p1098_p13), [#allocation2], %s517_s8 }
  0x56   : > { %755 = dma.done.wait (%p1099_p5), %s211_s10, 128  }
  0x57   : > { %757 = vsyncadd (%p1099_p5), %s211_s10, 4294967168  ;;  %s518_s9 = sshll.u32 %s967_s23, 1  ;;  %s220_s7 = scalar_lea.sflag [#allocation6], %s967_s23 }
  0x58   : > { %s977_s22 = scalar_lea.vmem [#allocation5], %s518_s9 }
  0x59   : > { %759 = dma.done.wait (%p1099_p5), %s220_s7, 32  }
  0x5a   : > { %761 = vsyncadd (%p1099_p5), %s220_s7, 4294967264  ;;  %s519_s29 = sshll.u32 %s967_s23, 2  ;;  %v796_v0 = vmov 0.0   ;;  %vm268_vm0 = vcmask 1043456   ;;  %v266_v1 = vld [vmem:[%s214_s30] sm:$0xf]  ;;  %v264_v37 = vlaneseq }
  0x5b   : > { %s984_s6 = scalar_lea.vmem [#allocation7], %s519_s29  ;;  %s987_s4 = scalar_lea.vmem [#allocation8], %s519_s29  ;;  %v522_v2 = vld [vmem:[%s214_s30 + $0x4] sm:$0xf]  ;;  %v269_v3 = vsel %vm268_vm0, %v266_v1, -inf }
  0x5c   : > { %262 = vst [vmem:[%s984_s6] sm:$0xf] %v796_v0  ;;  %263 = vst [vmem:[%s987_s4] sm:$0xf] %v796_v0  ;;  %v301_v4 = vsel %vm268_vm0, %v522_v2, -inf  ;;  %v270_v5 = vrot.slane %v269_v3, 4  ;;  %v265_v38 = vshrl.u32 %v264_v37, 7  ;;  %s527_s24 = sshll.u32 %s784_s15, 6 }
  0x5d   : > { %v302_v6 = vrot.slane %v301_v4, 4  ;;  %v521_v39 = vld [vmem:[%s977_s22] ss:$0 sm:$0xff]  ;;  %v524_v40 = vld [vmem:[%s977_s22 + $0x1] ss:$0 sm:$0xff]  ;;  %s354_s5 = sshll.u32 %s984_s6, 4  ;;  %s1004_s19 = scalar_lea.hbm %s1086_s2, %s527_s24  ;;  %s1006_s5 = int_to_ptr.vmem [resolvable:$true] %s354_s5 }
  0x5e   : > { %v271_v7 = vmax.f32 %v269_v3, %v270_v5  ;;  %vm292_vm1 = vcmp.eq.s32.totalorder %v521_v39, %v265_v38  ;;  %vm324_vm2 = vcmp.eq.s32.totalorder %v524_v40, %v265_v38  ;;  %s367_s18 = sshll.u32 %s987_s4, 4  ;;  %s1011_s8 = scalar_lea.hbm %s1087_s3, %s527_s24  ;;  %s1013_s18 = int_to_ptr.vmem [resolvable:$true] %s367_s18 }
  0x5f   : > { %v303_v8 = vmax.f32 %v301_v4, %v302_v6  ;;  %s336_s10 = scalar_lea.sflag [#allocation4], %s967_s23  ;;  %s674_s30 = scalar_lea.vmem %s1006_s5, 64 }
  0x60   : > { %v272_v9 = vrot.slane %v271_v7, 2  ;;  %p675_p8 = scmp.ne.s32.totalorder %s1006_s5, %s674_s30  ;;  %p1100_p0 = scmp.ne.s32.totalorder %s1092_s25, 0 }
  0x61   : > { %v304_v10 = vrot.slane %v303_v8, 2  ;;  %s797_s9 = smov [#allocation7]  }
  0x62   : > { %v273_v11 = vmax.f32 %v271_v7, %v272_v9  ;;  %p676_p7 = pnand %p675_p8, %p1100_p0  ;;  %s678_s7 = sshll.u32 %s797_s9, 4  ;;  %s679_s7 = int_to_ptr.vmem [resolvable:$false] %s678_s7 }
  0x63   : > { %v305_v12 = vmax.f32 %v303_v8, %v304_v10  ;;  %v329_v48 = vld [vmem:[%s984_s6] sm:$0xf]  ;;  %v332_v50 = vld [vmem:[%s987_s4] sm:$0xf]  ;;  %s680_s22 = scalar_lea.vmem %s679_s7, 128  ;;  %p681_p10 = scmp.lt.s32.totalorder %s1006_s5, %s679_s7 }
  0x64   : > { %v274_v13 = vrot.slane %v273_v11, 1  ;;  %p677_p4 = pneg %p676_p7  ;;  %p682_p12 = scmp.lt.s32.totalorder %s680_s22, %s674_s30 }
  0x65   : > { %v306_v14 = vrot.slane %v305_v12, 1 }
  0x66   : > { %v275_v15 = vmax.f32 %v273_v11, %v274_v13  ;;  %p683_p1 = por %p682_p12, %p681_p10 }
  0x67   : > { %v307_v16 = vmax.f32 %v305_v12, %v306_v14 }
  0x68   : > { %v276_v17 = vsub.f32 %v266_v1, %v275_v15  ;;  %p684_p2 = pnand %p683_p1, %p677_p4 }
  0x69   : > { %v308_v18 = vsub.f32 %v522_v2, %v307_v16 }
  0x6a   : > { %v277_v19 = vmul.f32 1.442695, %v276_v17 }
  0x6b   : > { %v309_v20 = vmul.f32 1.442695, %v308_v18 }
  0x6c   : > { %606 = vpow2.f32 %v277_v19 }
  0x6d   : > { %608 = vpow2.f32 %v309_v20 }
  0x76   : > { %v607_v21 = vpop.eup %606 }
  0x77   : > { %v609_v22 = vpop.eup %608  ;;  %v279_v23 = vsel %vm268_vm0, %v607_v21, 0.0 }
  0x78   : > { %v280_v24 = vrot.slane %v279_v23, 4  ;;  %v311_v25 = vsel %vm268_vm0, %v609_v22, 0.0 }
  0x79   : > { %v312_v26 = vrot.slane %v311_v25, 4 }
  0x7a   : > { %v281_v27 = vadd.f32 %v280_v24, %v279_v23 }
  0x7b   : > { %v313_v28 = vadd.f32 %v312_v26, %v311_v25 }
  0x7c   : > { %v282_v29 = vrot.slane %v281_v27, 2 }
  0x7d   : > { %v314_v30 = vrot.slane %v313_v28, 2 }
  0x7e   : > { %v283_v31 = vadd.f32 %v282_v29, %v281_v27 }
  0x7f   : > { %v315_v32 = vadd.f32 %v314_v30, %v313_v28 }
  0x80   : > { %v284_v33 = vrot.slane %v283_v31, 1 }
  0x81   : > { %v316_v34 = vrot.slane %v315_v32, 1 }
  0x82   : > { %v285_v35 = vadd.f32 %v284_v33, %v283_v31 }
  0x83   : > { %v317_v36 = vadd.f32 %v316_v34, %v315_v32 }
  0x84   : > { %610 = vrcp.f32 %v285_v35 }
  0x85   : > { %612 = vrcp.f32 %v317_v36 }
  0x8e   : > { %v611_v41 = vpop.eup %610 }
  0x8f   : > { %v613_v42 = vpop.eup %612  ;;  %v287_v43 = vmul.f32 %v611_v41, %v607_v21 }
  0x90   : > { %v319_v44 = vmul.f32 %v613_v42, %v609_v22 }
  0x91   : > { %v293_v45 = vsel %vm292_vm1, %v287_v43, 0.0  ;;  %v294_v46 = vsel %vm292_vm1, 1.0, %v287_v43 }
  0x92   : > { %v325_v47 = vsel %vm324_vm2, %v319_v44, 0.0  ;;  %v326_v49 = vsel %vm324_vm2, 1.0, %v319_v44 }
  0x93   : > { %v327_v51 = vadd.f32 %v325_v47, %v293_v45  ;;  %v328_v52 = vadd.f32 %v326_v49, %v294_v46 }
  0x95   : > { %v330_v53 = vadd.f32 %v329_v48, %v327_v51  ;;  %v333_v54 = vadd.f32 %v332_v50, %v328_v52 }
  0x97   : > { %331 = vst [vmem:[%s984_s6] sm:$0xf] %v330_v53  ;;  %334 = vst [vmem:[%s987_s4] sm:$0xf] %v333_v54 }
  0x98   : > { %687 = shalt.err (!%p684_p2)
}
  0x99   : > { %s688_s29 = scalar_lea.hbm %s1004_s19, 64  ;;  %s692_s24 = scalar_lea.hbm %s1086_s2, 128 }
  0x9a   : > { %p689_p9 = scmp.ne.s32.totalorder %s1004_s19, %s688_s29  ;;  %p693_p6 = scmp.lt.u32.totalorder %s1004_s19, %s1086_s2 }
  0x9b   : > { %p694_p13 = scmp.lt.u32.totalorder %s692_s24, %s688_s29  ;;  %p696_p8 = scmp.lt.u32.totalorder %s688_s29, %s1004_s19 }
  0x9c   : > { %p690_p11 = pnand %p689_p9, %p1100_p0 }
  0x9d   : > { %p695_p5 = por %p694_p13, %p693_p6 }
  0x9e   : > { %p691_p3 = pneg %p690_p11 }
  0x9f   : > { %p697_p7 = por %p696_p8, %p695_p5 }
  0xa1   : > { %p698_p4 = pnand %p697_p7, %p691_p3 }
  0xa3   : > { %701 = shalt.err (!%p698_p4)
}
  0xa4   : > { %537 = dma.vmem_to_hbm [thread:$0]  (%p1100_p0), %s1006_s5, 64, %s1004_s19, %s336_s10  }
  0xa5   : > { %s341_s15 = scalar_lea.sflag [#allocation9], %s967_s23  ;;  %s702_s21 = scalar_lea.vmem %s1013_s18, 64 }
  0xa6   : > { %p703_p10 = scmp.ne.s32.totalorder %s1013_s18, %s702_s21  ;;  %s798_s30 = smov [#allocation8]  }
  0xa7   : > { %s706_s9 = sshll.u32 %s798_s30, 4  ;;  %s707_s9 = int_to_ptr.vmem [resolvable:$false] %s706_s9 }
  0xa8   : > { %p704_p12 = pnand %p703_p10, %p1100_p0  ;;  %s708_s7 = scalar_lea.vmem %s707_s9, 128 }
  0xa9   : > { %p709_p2 = scmp.lt.s32.totalorder %s1013_s18, %s707_s9  ;;  %p710_p9 = scmp.lt.s32.totalorder %s708_s7, %s702_s21 }
  0xaa   : > { %p705_p1 = pneg %p704_p12 }
  0xab   : > { %p711_p11 = por %p710_p9, %p709_p2 }
  0xad   : > { %p712_p3 = pnand %p711_p11, %p705_p1 }
  0xaf   : > { %715 = shalt.err (!%p712_p3)
}
  0xb0   : > { %s716_s23 = scalar_lea.hbm %s1011_s8, 64  ;;  %s720_s10 = scalar_lea.hbm %s1087_s3, 128 }
  0xb1   : > { %p717_p6 = scmp.ne.s32.totalorder %s1011_s8, %s716_s23  ;;  %p721_p8 = scmp.lt.u32.totalorder %s1011_s8, %s1087_s3 }
  0xb2   : > { %p722_p7 = scmp.lt.u32.totalorder %s720_s10, %s716_s23  ;;  %p724_p10 = scmp.lt.u32.totalorder %s716_s23, %s1011_s8 }
  0xb3   : > { %p718_p13 = pnand %p717_p6, %p1100_p0 }
  0xb4   : > { %p723_p4 = por %p722_p7, %p721_p8 }
  0xb5   : > { %p719_p5 = pneg %p718_p13 }
  0xb6   : > { %p725_p12 = por %p724_p10, %p723_p4 }
  0xb8   : > { %p726_p1 = pnand %p725_p12, %p719_p5 }
  0xba   : > { %729 = shalt.err (!%p726_p1)
}
  0xbb   : > { %538 = dma.vmem_to_hbm [thread:$0]  (%p1100_p0), %s1013_s18, 64, %s1011_s8, %s341_s15  }
  0xbc PF: > { %s379_s6 = sand.u32 1, %s772_s12   ;;  %p1101_p2 = scmp.ne.s32.totalorder %s1093_s27, 0 }
  0xbd   : > { %p1102_p9 = scmp.ge.s32.totalorder %s792_s17, 2  ;;  %s380_s4 = scalar_lea.sflag [#allocation4], %s379_s6 }
  0xbf   : > { %p549_p11 = pnand %p1102_p9, %p1101_p2 }
  0xc1   : > { %763 = dma.done.wait (!%p549_p11), %s380_s4, 64  }
  0xc2   : > { %765 = vsyncadd (!%p549_p11), %s380_s4, 4294967232  ;;  %s389_s24 = scalar_lea.sflag [#allocation9], %s379_s6 }
  0xc3   : > { %767 = dma.done.wait (!%p549_p11), %s389_s24, 64  }
  0xc4   : > { %769 = vsyncadd (!%p549_p11), %s389_s24, 4294967232  ;;  %s26_s17 = sadd.s32 1, %s792_s17   ;;  %s1103_s12 = smov %s776_s13 }
  0xc5   : > { %p23_p3 = scmp.ge.s32.totalorder %s26_s17, 4   ;;  %s1104_s13 = smov %s780_s14 }
  0xc6   : > { %s1105_s14 = smov %s875_s26  ;;  %s1106_s15 = smov %s788_s16 }
  0xc7   : > { %s1107_s16 = smov %s1109_s20  ;;  %25 = sbr.rel (!%p23_p3) target bundleno = 10 (0xa), region = 109 }
  0xce   :  { %394 = vsyncpa [#allocation3], 1 }
  0xcf   :  { %396 = vsyncpa [#allocation3 + $0x1], 1 }
  0xd0   :  { %397 = vsyncpa [#allocation6], 1 }
  0xd1   :  { %399 = vsyncpa [#allocation6 + $0x1], 1 }
  0xd2   :  { %400 = vsyncpa [#allocation4], 1 }
  0xd3   :  { %402 = vsyncpa [#allocation4 + $0x1], 1 }
  0xd4   :  { %403 = vsyncpa [#allocation9], 1 }
  0xd5   :  { %405 = vsyncpa [#allocation9 + $0x1], 1 }

</bundles_post_ra>
